<compile_context>
chip_gen: v5e
topology: v5e:2x2
jax: 0.10.0
libtpu: 0.0.40
codegen_flags: <defaults>
</compile_context>

<pallas_src>
import numpy as np
import jax
import jax.numpy as jnp
from jax.experimental import pallas as pl
from jax.experimental.pallas import tpu as pltpu


# ---------------- synthetic "args" (deterministic, small) ----------------
class Args:
    num_segments = 2
    motion_len = 2
    new_length = 1
    batch_size = 2
    motion_val = 0.5
    attack_type = "1"   # default path: pertu = motionpertu


args = Args()


def frame_indices_np(a):
    # exactly the list comprehension from Attack.__init__
    return np.array(
        [(k * (a.motion_len + a.new_length) + j) * 3 + i
         for k in range(0, a.num_segments)
         for j in range(a.motion_len, a.motion_len + a.new_length)
         for i in range(0, 3)],
        dtype=np.int32,
    )


def triple_bases_np(a):
    # frame_indices is built from contiguous (i = 0..2) triples; return the
    # base channel of each triple.  Used for 3-wide static slices in-kernel.
    return np.array(
        [(k * (a.motion_len + a.new_length) + j) * 3
         for k in range(0, a.num_segments)
         for j in range(a.motion_len, a.motion_len + a.new_length)],
        dtype=np.int32,
    )


# ---------------- Pallas kernel ----------------
def make_attack_kernel(bases, C, motion_len, motion_val, step_weight):
    """bases/C/motion_len are compile-time Python ints -> static slicing only."""
    bases = [int(b) for b in bases]

    def kernel(x_ref, inp_ref, pertu_ref):
        x = x_ref[...]                               # (B, C, H*W) in VMEM, one load

        # Channel gather of the frame indices (static slices, concat on sublanes).
        inp = jnp.concatenate([x[:, b:b + 3, :] for b in bases], axis=1)

        # motioninput = input*(1-motion_val) + sum_step rolled_gather * w
        acc = inp * (1.0 - motion_val)
        for step in range(1, motion_len + 1):        # static unroll (motion_len=2)
            rolled = jnp.concatenate(
                [x[:, ((b - 3 * step) % C):((b - 3 * step) % C) + 3, :]
                 for b in bases],
                axis=1)
            acc = acc + rolled * step_weight

        # Single full-tile, lane-dense stores (last dim = H*W, multiple of 128).
        inp_ref[...] = inp
        pertu_ref[...] = acc - inp                   # motionpertu

    return kernel


def attack_forward(addition_input, target, a=args):
    """Default-path Attack.forward: returns (input, pertu=motionpertu)."""
    del target  # only consumed by the (external) model / criterion
    B, C, H, W = addition_input.shape
    HW = H * W

    idx = frame_indices_np(a)
    bases = triple_bases_np(a)
    Cg = idx.shape[0]

    # frameval is hard-coded to ones(B, 10) in the module, so
    # stdval[:, col] == motion_val / 10 exactly, for every batch and column.
    step_weight = float(a.motion_val) / 10.0

    # Lane-dense layout: flatten H*W into the last dim (H*W = 256 here).
    x_flat = addition_input.reshape(B, C, HW)

    kernel = make_attack_kernel(bases, C, a.motion_len, float(a.motion_val),
                                step_weight)

    out_shape = (
        jax.ShapeDtypeStruct((B, Cg, HW), jnp.float32),   # input (gathered)
        jax.ShapeDtypeStruct((B, Cg, HW), jnp.float32),   # motionpertu
    )

    fn = pl.pallas_call(
        kernel,
        out_shape=out_shape,
        # No grid: everything fits in VMEM; one DMA in, two DMAs out.
        in_specs=[pl.BlockSpec(memory_space=pltpu.MemorySpace.VMEM)],
        out_specs=[pl.BlockSpec(memory_space=pltpu.MemorySpace.VMEM),
                   pl.BlockSpec(memory_space=pltpu.MemorySpace.VMEM)],
    )
    inp_flat, pertu_flat = fn(x_flat)
    return inp_flat.reshape(B, Cg, H, W), pertu_flat.reshape(B, Cg, H, W)


# ---------------- plain-JAX reference (mirrors the PyTorch code) ----------------
def attack_forward_ref(addition_input, a=args):
    idx = jnp.asarray(frame_indices_np(a))
    frameval = jnp.ones((a.batch_size, 10), dtype=jnp.float32)
    stdval = (frameval * a.motion_val) / jnp.sum(frameval, axis=1, keepdims=True)

    inp = addition_input[:, idx, :, :]
    motion = inp * (1.0 - a.motion_val)
    rolled = addition_input
    for step in range(1, a.motion_len + 1):
        rolled = jnp.roll(rolled, 3, axis=1)
        w = stdval[:, a.motion_len - step].reshape(a.batch_size, 1, 1, 1)
        motion = motion + rolled[:, idx, :, :] * w
    return inp, motion - inp


if __name__ == "__main__":
    B = args.batch_size
    C = args.num_segments * (args.motion_len + args.new_length) * 3   # 18
    H = W = 16

    key = jax.random.PRNGKey(0)
    k1, k2 = jax.random.split(key)
    addition_input = jax.random.uniform(k1, (B, C, H, W), dtype=jnp.float32)
    target = jax.random.randint(k2, (B,), 0, 10, dtype=jnp.int32)

    inp, pertu = attack_forward(addition_input, target)
    jax.block_until_ready((inp, pertu))

    inp_ref, pertu_ref = attack_forward_ref(addition_input)
    np.testing.assert_allclose(np.asarray(inp), np.asarray(inp_ref), rtol=1e-5, atol=1e-5)
    np.testing.assert_allclose(np.asarray(pertu), np.asarray(pertu_ref), rtol=1e-5, atol=1e-5)

    print("KERNEL_OK")
</pallas_src>

<mosaic_0001>
module attributes {stable_mosaic.version = 11 : i64} {
  func.func @kernel(%arg0: memref<2x18x256xf32, #tpu.memory_space<vmem>>, %arg1: memref<2x6x256xf32, #tpu.memory_space<vmem>>, %arg2: memref<2x6x256xf32, #tpu.memory_space<vmem>>) attributes {dimension_semantics = [], scalar_prefetch = 0 : i64, scratch_operands = 0 : i64, tpu.core_type = #tpu.core_type<tc>} {
    %c0 = arith.constant 0 : index
    %c0_0 = arith.constant 0 : index
    %c0_1 = arith.constant 0 : index
    %0 = vector.load %arg0[%c0, %c0_0, %c0_1] : memref<2x18x256xf32, #tpu.memory_space<vmem>>, vector<2x18x256xf32>
    %1 = vector.extract_strided_slice %0 {offsets = [0, 6, 0], sizes = [2, 3, 256], strides = [1, 1, 1]} : vector<2x18x256xf32> to vector<2x3x256xf32>
    %2 = vector.extract_strided_slice %0 {offsets = [0, 15, 0], sizes = [2, 3, 256], strides = [1, 1, 1]} : vector<2x18x256xf32> to vector<2x3x256xf32>
    %3 = tpu.concatenate %1, %2 in 1 : vector<2x3x256xf32>, vector<2x3x256xf32> -> vector<2x6x256xf32>
    %cst = arith.constant 5.000000e-01 : f32
    %4 = vector.broadcast %cst : f32 to vector<2x6x256xf32>
    %5 = arith.mulf %3, %4 : vector<2x6x256xf32>
    %6 = vector.extract_strided_slice %0 {offsets = [0, 3, 0], sizes = [2, 3, 256], strides = [1, 1, 1]} : vector<2x18x256xf32> to vector<2x3x256xf32>
    %7 = vector.extract_strided_slice %0 {offsets = [0, 12, 0], sizes = [2, 3, 256], strides = [1, 1, 1]} : vector<2x18x256xf32> to vector<2x3x256xf32>
    %8 = tpu.concatenate %6, %7 in 1 : vector<2x3x256xf32>, vector<2x3x256xf32> -> vector<2x6x256xf32>
    %cst_2 = arith.constant 5.000000e-02 : f32
    %9 = vector.broadcast %cst_2 : f32 to vector<2x6x256xf32>
    %10 = arith.mulf %8, %9 : vector<2x6x256xf32>
    %11 = arith.addf %5, %10 : vector<2x6x256xf32>
    %12 = vector.extract_strided_slice %0 {offsets = [0, 0, 0], sizes = [2, 3, 256], strides = [1, 1, 1]} : vector<2x18x256xf32> to vector<2x3x256xf32>
    %13 = vector.extract_strided_slice %0 {offsets = [0, 9, 0], sizes = [2, 3, 256], strides = [1, 1, 1]} : vector<2x18x256xf32> to vector<2x3x256xf32>
    %14 = tpu.concatenate %12, %13 in 1 : vector<2x3x256xf32>, vector<2x3x256xf32> -> vector<2x6x256xf32>
    %cst_3 = arith.constant 5.000000e-02 : f32
    %15 = vector.broadcast %cst_3 : f32 to vector<2x6x256xf32>
    %16 = arith.mulf %14, %15 : vector<2x6x256xf32>
    %17 = arith.addf %11, %16 : vector<2x6x256xf32>
    %c0_4 = arith.constant 0 : index
    %c0_5 = arith.constant 0 : index
    %c0_6 = arith.constant 0 : index
    %18 = vector.load %arg1[%c0_4, %c0_5, %c0_6] : memref<2x6x256xf32, #tpu.memory_space<vmem>>, vector<2x6x256xf32>
    tpu.vector_store %arg1[%c0_4, %c0_5, %c0_6], %3 {strides = array<i32>} : memref<2x6x256xf32, #tpu.memory_space<vmem>>, vector<2x6x256xf32>,
    %19 = arith.subf %17, %3 : vector<2x6x256xf32>
    %c0_7 = arith.constant 0 : index
    %c0_8 = arith.constant 0 : index
    %c0_9 = arith.constant 0 : index
    %20 = vector.load %arg2[%c0_7, %c0_8, %c0_9] : memref<2x6x256xf32, #tpu.memory_space<vmem>>, vector<2x6x256xf32>
    tpu.vector_store %arg2[%c0_7, %c0_8, %c0_9], %19 {strides = array<i32>} : memref<2x6x256xf32, #tpu.memory_space<vmem>>, vector<2x6x256xf32>,
    return
  }
}

</mosaic_0001>

<bundles_post_ra>
// kernel: tpu_custom_call.1
= control target key start
LH: loop header
LB: loop body
LE: loop exit
PB: predicated region body
PF: predicated region fallthrough
CT: control target
= control target key end

     0   :  { %vm30_vm0 = vcmask 1041408   ;;  %vm51_vm1 = vcmask 1043456   ;;  %vm68_vm2 = vcmask 1042432   ;;  %s236_s0 = inlined_call_operand.vmem [shape: f32[2,18,256], index: 0, kind: input, shape index: {}]   ;;  %s237_s1 = inlined_call_operand.vmem [shape: f32[2,6,256], index: 1, kind: output, shape index: {0}]   ;;  %s238_s2 = inlined_call_operand.vmem [shape: f32[2,6,256], index: 2, kind: output, shape index: {1}]  }
   0x1   :  { %v10_v0 = vld [vmem:[%s236_s0] sm:$0xff]  ;;  %v12_v1 = vld [vmem:[%s236_s0 + $0x10] sm:$0xff]  ;;  %v11_v7 = vld [vmem:[%s236_s0 + $0x8] sm:$0xff] }
   0x2   :  { %v14_v2 = vld [vmem:[%s236_s0 + $0x20] sm:$0x3]  ;;  %v31_v3 = vrot.slane %v10_v0, 6  ;;  %v32_v4 = vrot.slane %v12_v1, 6  ;;  %v52_v5 = vrot.slane %v12_v1, 4  ;;  %v13_v8 = vld [vmem:[%s236_s0 + $0x18] sm:$0xff] }
   0x3   :  { %v53_v6 = vrot.slane %v14_v2, 4  ;;  %v15_v9 = vld [vmem:[%s236_s0 + $0x28] sm:$0x3]  ;;  %v34_v10 = vrot.slane %v11_v7, 6  ;;  %v35_v11 = vrot.slane %v13_v8, 6  ;;  %v55_v12 = vrot.slane %v13_v8, 4 }
   0x4   :  { %v16_v13 = vld [vmem:[%s236_s0 + $0x30] sm:$0xff]  ;;  %v33_v14 = vsel %vm30_vm0, %v31_v3, %v32_v4  ;;  %v56_v16 = vrot.slane %v15_v9, 4  ;;  %v18_v17 = vld [vmem:[%s236_s0 + $0x40] sm:$0xff]  ;;  %v17_v20 = vld [vmem:[%s236_s0 + $0x38] sm:$0xff]  ;;  %v77_v36 = vrot.slane %v10_v0, 3  ;;  %v85_v39 = vrot.slane %v12_v1, 1 }
   0x5   :  { %v54_v15 = vsel %vm51_vm1, %v52_v5, %v53_v6  ;;  %v20_v18 = vld [vmem:[%s236_s0 + $0x50] sm:$0x3]  ;;  %v37_v19 = vrot.slane %v16_v13, 6  ;;  %v36_v22 = vsel %vm30_vm0, %v34_v10, %v35_v11  ;;  %v38_v23 = vrot.slane %v18_v17, 6  ;;  %v19_v25 = vld [vmem:[%s236_s0 + $0x48] sm:$0xff] }
   0x6   :  { %v69_v21 = vsel %vm68_vm2, %v33_v14, %v54_v15  ;;  %v58_v24 = vrot.slane %v18_v17, 4  ;;  %v21_v26 = vld [vmem:[%s236_s0 + $0x58] sm:$0x3]  ;;  %v57_v27 = vsel %vm51_vm1, %v55_v12, %v56_v16  ;;  %v59_v28 = vrot.slane %v20_v18, 4 }
   0x7   :  { %121 = vst [vmem:[%s237_s1] sm:$0x3f] %v69_v21  ;;  %v40_v29 = vrot.slane %v17_v20, 6  ;;  %v70_v30 = vsel %vm68_vm2, %v36_v22, %v57_v27  ;;  %v39_v31 = vsel %vm30_vm0, %v37_v19, %v38_v23  ;;  %v41_v32 = vrot.slane %v19_v25, 6 }
   0x8   :  { %v61_v33 = vrot.slane %v19_v25, 4  ;;  %122 = vst [vmem:[%s237_s1 + $0x8] sm:$0x3f] %v70_v30  ;;  %v60_v34 = vsel %vm51_vm1, %v58_v24, %v59_v28  ;;  %v62_v35 = vrot.slane %v21_v26, 4  ;;  %v109_v40 = vsel %vm68_vm2, %v10_v0, %v32_v4 }
   0x9   :  { %v71_v37 = vsel %vm68_vm2, %v39_v31, %v60_v34  ;;  %v42_v38 = vsel %vm30_vm0, %v40_v29, %v41_v32  ;;  %v73_v41 = vmul.f32 0.5, %v69_v21  ;;  %v113_v43 = vmul.f32 0.05, %v109_v40 }
   0xa   :  { %123 = vst [vmem:[%s237_s1 + $0x10] sm:$0x3f] %v71_v37  ;;  %v63_v42 = vsel %vm51_vm1, %v61_v33, %v62_v35  ;;  %v78_v44 = vrot.slane %v11_v7, 3  ;;  %v93_v46 = vsel %vm68_vm2, %v77_v36, %v85_v39  ;;  %v86_v47 = vrot.slane %v13_v8, 1 }
   0xb   :  { %v72_v45 = vsel %vm68_vm2, %v42_v38, %v63_v42  ;;  %v110_v48 = vsel %vm68_vm2, %v11_v7, %v35_v11  ;;  %v74_v49 = vmul.f32 0.5, %v70_v30  ;;  %v97_v50 = vmul.f32 0.05, %v93_v46 }
   0xc   :  { %124 = vst [vmem:[%s237_s1 + $0x18] sm:$0x3f] %v72_v45  ;;  %v79_v51 = vrot.slane %v16_v13, 3  ;;  %v111_v52 = vsel %vm68_vm2, %v16_v13, %v38_v23  ;;  %v75_v53 = vmul.f32 0.5, %v71_v37  ;;  %v94_v54 = vsel %vm68_vm2, %v78_v44, %v86_v47 }
   0xd   :  { %v114_v55 = vmul.f32 0.05, %v110_v48  ;;  %v87_v56 = vrot.slane %v18_v17, 1  ;;  %v101_v57 = vadd.f32 %v97_v50, %v73_v41  ;;  %v98_v58 = vmul.f32 0.05, %v94_v54 }
   0xe   :  { %v80_v59 = vrot.slane %v17_v20, 3  ;;  %v88_v60 = vrot.slane %v19_v25, 1  ;;  %v76_v61 = vmul.f32 0.5, %v72_v45  ;;  %v115_v63 = vmul.f32 0.05, %v111_v52 }
   0xf   :  { %v95_v62 = vsel %vm68_vm2, %v79_v51, %v87_v56  ;;  %v112_v0 = vsel %vm68_vm2, %v17_v20, %v41_v32  ;;  %v117_v1 = vadd.f32 %v113_v43, %v101_v57  ;;  %v102_v2 = vadd.f32 %v98_v58, %v74_v49 }
  0x10   :  { %v99_v3 = vmul.f32 0.05, %v95_v62  ;;  %v96_v4 = vsel %vm68_vm2, %v80_v59, %v88_v60  ;;  %v116_v6 = vmul.f32 0.05, %v112_v0 }
  0x11   :  { %v100_v5 = vmul.f32 0.05, %v96_v4  ;;  %v125_v7 = vsub.f32 %v117_v1, %v69_v21  ;;  %v118_v8 = vadd.f32 %v114_v55, %v102_v2 }
  0x12   :  { %v103_v9 = vadd.f32 %v99_v3, %v75_v53 }
  0x13   :  { %v104_v10 = vadd.f32 %v100_v5, %v76_v61  ;;  %129 = vst [vmem:[%s238_s2] sm:$0x3f] %v125_v7  ;;  %v126_v11 = vsub.f32 %v118_v8, %v70_v30 }
  0x14   :  { %v119_v12 = vadd.f32 %v115_v63, %v103_v9 }
  0x15   :  { %v120_v13 = vadd.f32 %v116_v6, %v104_v10  ;;  %130 = vst [vmem:[%s238_s2 + $0x8] sm:$0x3f] %v126_v11 }
  0x16   :  { %v127_v14 = vsub.f32 %v119_v12, %v71_v37 }
  0x17   :  { %v128_v15 = vsub.f32 %v120_v13, %v72_v45 }
  0x18   :  { %131 = vst [vmem:[%s238_s2 + $0x10] sm:$0x3f] %v127_v14 }
  0x19   :  { %132 = vst [vmem:[%s238_s2 + $0x18] sm:$0x3f] %v128_v15 }

</bundles_post_ra>
